<compile_context>
chip_gen: v5e
topology: v5e:2x2
jax: 0.10.0
libtpu: 0.0.40
codegen_flags: <defaults>
</compile_context>

<pallas_src>
import jax
import jax.numpy as jnp
from jax.experimental import pallas as pl
from jax.experimental.pallas import tpu as pltpu


def _while_count_kernel(bound_ref, out_ref):
    # bound_ref: SMEM (1,) int32 -- x.size(0)
    # out_ref:   SMEM (1,) int32 -- the resulting `sum`
    # Closed form of:  sum = 0; while bound > sum: sum += 1   ==>  max(bound, 0)
    out_ref[0] = jnp.maximum(bound_ref[0], jnp.int32(0))


@jax.jit
def _count_up_to(bound):
    """bound: (1,) int32 device array. Returns a () int32 scalar."""
    out = pl.pallas_call(
        _while_count_kernel,
        out_shape=jax.ShapeDtypeStruct((1,), jnp.int32),
        in_specs=[pl.BlockSpec(memory_space=pltpu.SMEM)],
        out_specs=pl.BlockSpec(memory_space=pltpu.SMEM),
        # 4 bytes in + 4 bytes out; zero flops -> scheduler treats it as free.
        cost_estimate=pl.CostEstimate(flops=0, transcendentals=0, bytes_accessed=8),
    )(bound)
    # Fold the scalar index into the jit: single dispatch, no host-side slice.
    return out[0]


def prim_loop_while_like(x):
    """Mirror of TorchPrimLoopWhileLikeModule.forward(x)."""
    # x's data is never read -- only its leading-dim size matters, so x is
    # deliberately NOT passed to pallas_call (no HBM/VMEM traffic, no grid).
    # The size is passed as a runtime scalar so one compiled binary serves all
    # leading dims.
    bound = jnp.asarray([x.shape[0]], dtype=jnp.int32)
    return _count_up_to(bound)


if __name__ == "__main__":
    key = jax.random.PRNGKey(0)
    # Small shape consistent with the ([-1, -1], int64) annotation.
    # (int32 element dtype: JAX default without x64 mode; elements are unused.)
    x = jax.random.randint(key, (6, 8), minval=-10, maxval=10, dtype=jnp.int32)

    result = prim_loop_while_like(x)
    result = jax.block_until_ready(result)

    expected = max(x.shape[0], 0)  # while-loop counts up to x.size(0)
    assert int(result) == expected, f"got {int(result)}, want {expected}"

    # Same compiled binary handles a different leading dim (no retrace).
    x2 = jax.random.randint(key, (3, 5), minval=-10, maxval=10, dtype=jnp.int32)
    result2 = jax.block_until_ready(prim_loop_while_like(x2))
    assert int(result2) == 3, f"got {int(result2)}, want 3"

    print("KERNEL_OK")
</pallas_src>

<mosaic_0001>
module attributes {stable_mosaic.version = 11 : i64} {
  func.func @_while_count_kernel(%arg0: memref<1xi32, #tpu.memory_space<smem>>, %arg1: memref<1xi32, #tpu.memory_space<smem>>) attributes {dimension_semantics = [], scalar_prefetch = 0 : i64, scratch_operands = 0 : i64, tpu.core_type = #tpu.core_type<tc>} {
    %c0 = arith.constant 0 : index
    %0 = memref.load %arg0[%c0] : memref<1xi32, #tpu.memory_space<smem>>
    %c0_i32 = arith.constant 0 : i32
    %1 = arith.maxsi %0, %c0_i32 : i32
    %c0_0 = arith.constant 0 : index
    %2 = memref.load %arg1[%c0_0] : memref<1xi32, #tpu.memory_space<smem>>
    memref.store %1, %arg1[%c0_0] : memref<1xi32, #tpu.memory_space<smem>>
    return
  }
}

</mosaic_0001>

<bundles_post_ra>
// kernel: _count_up_to.1
= control target key start
LH: loop header
LB: loop body
LE: loop exit
PB: predicated region body
PF: predicated region fallthrough
CT: control target
= control target key end

     0   :  { %7 = vsyncpa [#allocation4], 0  ;;  %s45_s13 = smov [#allocation3]   ;;  %s65_s0 = inlined_call_operand.<no memory space> [shape: s32[1], index: 0, kind: input, shape index: {}]   ;;  %s66_s1 = inlined_call_operand.hbm [shape: s32[1], index: 1, kind: output, shape index: {}]  }
   0x1   :  { %p11_p0 = scmp.gt.s32.totalorder %s65_s0, 0  ;;  %s20_s10 = sshll.u32 %s66_s1, 4  ;;  %s21_s10 = int_to_ptr.hbm [resolvable:$true] %s20_s10 }
   0x3   :  { %s68_s0 = smov (!%p11_p0, %s65_s0), 0 }
   0x4   :  { %14 = sst [smem:[#allocation3]] %s68_s0 }
   0x5   :  { %23 = dma.smem_to_hbm %s45_s13, 16, %s21_s10, [#allocation4]  }
   0x6   :  { %43 = dma.done.wait [#allocation4], 16  }
   0x7   :  { %44 = vsyncadd [#allocation4], 4294967280 }
   0x8   :  { %28 = sfence }
   0x9   :  { %29 = vsyncpa [#allocation4], 1 }

</bundles_post_ra>
